<compile_context>
chip_gen: v7x
topology: tpu7x:2x2x1
jax: 0.10.0
libtpu: 0.0.40
codegen_flags: <defaults>
</compile_context>

<pallas_src>
import math

import jax
import jax.numpy as jnp
from jax.experimental import pallas as pl
from jax.experimental.pallas import tpu as pltpu

LANES = 128
ROW_ALIGN = 16       # sublane alignment that also covers bf16 (16,128) packing
NCORES = 2           # leading parallel grid axis (v7x megacore; no-op on 1-TC chips)
_LN2 = math.log(2.0)


def _logcosh_kernel(pred_ref, tgt_ref, err2_ref, lcgt_ref, gt_ref):
    """Per grid step accumulate vreg-shaped partials into the resident output blocks.

    err2_ref : (1, 8, 128) running sum of (p - t)^2
    lcgt_ref : (1, 8, 128) running sum of logcosh(p - t) where p > t
    gt_ref   : (1, 8, 128) running count of (p > t)
    """
    i = pl.program_id(1)

    @pl.when(i == 0)
    def _init():
        err2_ref[...] = jnp.zeros_like(err2_ref)
        lcgt_ref[...] = jnp.zeros_like(lcgt_ref)
        gt_ref[...] = jnp.zeros_like(gt_ref)

    p = pred_ref[...].astype(jnp.float32)
    t = tgt_ref[...].astype(jnp.float32)
    err = p - t
    a = jnp.abs(err)
    # Stable log-cosh: |x| + log(1 + exp(-2|x|)) - log(2)  (2 EUP ops, no overflow)
    lc = a + jnp.log(1.0 + jnp.exp(-2.0 * a)) - _LN2
    gt = (p > t).astype(jnp.float32)

    def _tile_partials(x):
        # (tile_rows, 128) -> (1, 8, 128): reshape is a free relabeling of the
        # (8,128) vreg tiling; the leading-axis sum is pure VPU adds.
        return jnp.sum(x.reshape(-1, 8, LANES), axis=0)[None]

    err2_ref[...] += _tile_partials(err * err)
    lcgt_ref[...] += _tile_partials(lc * gt)
    gt_ref[...] += _tile_partials(gt)


def custom_log_cosh_loss(predictions, targets, *, tile_rows=1024):
    assert predictions.shape == targets.shape
    n_total = predictions.size

    flat_p = predictions.reshape(-1)
    flat_t = targets.reshape(-1)

    rows_needed = pl.cdiv(n_total, LANES)
    # Clamp the tile to the (aligned) problem size; keep it sublane/pack aligned.
    tile_rows = int(tile_rows)
    tile_rows = max(ROW_ALIGN,
                    min(tile_rows, pl.cdiv(rows_needed, ROW_ALIGN) * ROW_ALIGN))
    tile_rows = pl.cdiv(tile_rows, ROW_ALIGN) * ROW_ALIGN

    blocks = pl.cdiv(rows_needed, tile_rows)
    blocks_per_core = pl.cdiv(blocks, NCORES)
    rows_padded = NCORES * blocks_per_core * tile_rows

    pad = rows_padded * LANES - n_total
    if pad:
        # Zero padding contributes nothing to any accumulator (see header comment).
        flat_p = jnp.pad(flat_p, (0, pad))
        flat_t = jnp.pad(flat_t, (0, pad))

    # Keep the original dtype: the kernel casts to f32 internally, so bf16/f16
    # inputs stream half the HBM bytes.
    p2d = flat_p.reshape(rows_padded, LANES)
    t2d = flat_t.reshape(rows_padded, LANES)

    in_spec = pl.BlockSpec(
        (tile_rows, LANES),
        lambda c, i, _n=blocks_per_core: (c * _n + i, 0),
    )
    out_spec = pl.BlockSpec((1, 8, LANES), lambda c, i: (c, 0, 0))
    part_shape = jax.ShapeDtypeStruct((NCORES, 8, LANES), jnp.float32)

    # VMEM: 2 inputs x 2 pipeline buffers x tile bytes = 2 MiB at tile_rows=1024/f32,
    # comfortably under every generation's default scoped VMEM (no vmem_limit needed).
    err2_p, lcgt_p, gt_p = pl.pallas_call(
        _logcosh_kernel,
        out_shape=(part_shape, part_shape, part_shape),
        grid_spec=pltpu.PrefetchScalarGridSpec(
            num_scalar_prefetch=0,
            grid=(NCORES, blocks_per_core),
            in_specs=[in_spec, in_spec],
            out_specs=(out_spec, out_spec, out_spec),
        ),
        compiler_params=pltpu.CompilerParams(
            dimension_semantics=("parallel", "arbitrary"),
        ),
    )(p2d, t2d)

    # Tiny final combine over the (2, 8, 128) per-core partials.
    n = jnp.float32(n_total)
    sum_err2 = jnp.sum(err2_p)
    sum_lc_gt = jnp.sum(lcgt_p)
    cnt_le = n - jnp.sum(gt_p)
    mse = sum_err2 / n
    # mean(where(p > t, logcosh(err), 2*mse)) = (sum_lc_gt + cnt_le * 2 * mse) / N
    return (sum_lc_gt + cnt_le * 2.0 * mse) / n


def _reference(predictions, targets):
    err = predictions - targets
    lc = jnp.log(jnp.cosh(err))
    mse = jnp.mean(err ** 2)
    loss = jnp.where(predictions > targets, lc, mse * 2)
    return jnp.mean(loss)


if __name__ == "__main__":
    key = jax.random.PRNGKey(0)
    k1, k2 = jax.random.split(key)
    shape = (2, 4, 16, 16)  # NCHW-like, 2048 elements
    predictions = jax.random.normal(k1, shape, dtype=jnp.float32)
    targets = jax.random.normal(k2, shape, dtype=jnp.float32)

    loss = custom_log_cosh_loss(predictions, targets)
    jax.block_until_ready(loss)

    ref = _reference(predictions, targets)
    assert jnp.allclose(loss, ref, rtol=1e-5, atol=1e-6), (loss, ref)
    print("KERNEL_OK")
</pallas_src>

<mosaic_0001>
module attributes {stable_mosaic.version = 11 : i64} {
  func.func @_logcosh_kernel(%arg0: i32, %arg1: i32, %arg2: memref<16x128xf32, #tpu.memory_space<vmem>>, %arg3: memref<16x128xf32, #tpu.memory_space<vmem>>, %arg4: memref<1x8x128xf32, #tpu.memory_space<vmem>>, %arg5: memref<1x8x128xf32, #tpu.memory_space<vmem>>, %arg6: memref<1x8x128xf32, #tpu.memory_space<vmem>>) attributes {dimension_semantics = [#tpu.dimension_semantics<parallel>, #tpu.dimension_semantics<arbitrary>], iteration_bounds = array<i64: 2, 1>, scalar_prefetch = 0 : i64, scratch_operands = 0 : i64, tpu.core_type = #tpu.core_type<tc>, window_params = [{transform_indices = @transform_0, window_bounds = array<i64: 16, 128>}, {transform_indices = @transform_1, window_bounds = array<i64: 16, 128>}, {transform_indices = @transform_2, window_bounds = array<i64: 1, 8, 128>}, {transform_indices = @transform_3, window_bounds = array<i64: 1, 8, 128>}, {transform_indices = @transform_4, window_bounds = array<i64: 1, 8, 128>}]} {
    %c0_i32 = arith.constant 0 : i32
    %0 = arith.cmpi eq, %arg1, %c0_i32 : i32
    %1 = arith.extui %0 : i1 to i32
    %c0_i32_0 = arith.constant 0 : i32
    %2 = arith.cmpi ne, %1, %c0_i32_0 : i32
    scf.if %2 {
      %cst_27 = arith.constant 0.000000e+00 : f32
      %39 = vector.broadcast %cst_27 : f32 to vector<1x8x128xf32>
      %c0_28 = arith.constant 0 : index
      %c0_29 = arith.constant 0 : index
      %c0_30 = arith.constant 0 : index
      %40 = vector.load %arg4[%c0_28, %c0_29, %c0_30] : memref<1x8x128xf32, #tpu.memory_space<vmem>>, vector<1x8x128xf32>
      tpu.vector_store %arg4[%c0_28, %c0_29, %c0_30], %39 {strides = array<i32>} : memref<1x8x128xf32, #tpu.memory_space<vmem>>, vector<1x8x128xf32>,
      %cst_31 = arith.constant 0.000000e+00 : f32
      %41 = vector.broadcast %cst_31 : f32 to vector<1x8x128xf32>
      %c0_32 = arith.constant 0 : index
      %c0_33 = arith.constant 0 : index
      %c0_34 = arith.constant 0 : index
      %42 = vector.load %arg5[%c0_32, %c0_33, %c0_34] : memref<1x8x128xf32, #tpu.memory_space<vmem>>, vector<1x8x128xf32>
      tpu.vector_store %arg5[%c0_32, %c0_33, %c0_34], %41 {strides = array<i32>} : memref<1x8x128xf32, #tpu.memory_space<vmem>>, vector<1x8x128xf32>,
      %cst_35 = arith.constant 0.000000e+00 : f32
      %43 = vector.broadcast %cst_35 : f32 to vector<1x8x128xf32>
      %c0_36 = arith.constant 0 : index
      %c0_37 = arith.constant 0 : index
      %c0_38 = arith.constant 0 : index
      %44 = vector.load %arg6[%c0_36, %c0_37, %c0_38] : memref<1x8x128xf32, #tpu.memory_space<vmem>>, vector<1x8x128xf32>
      tpu.vector_store %arg6[%c0_36, %c0_37, %c0_38], %43 {strides = array<i32>} : memref<1x8x128xf32, #tpu.memory_space<vmem>>, vector<1x8x128xf32>,
    } else {
    }
    %c0 = arith.constant 0 : index
    %c0_1 = arith.constant 0 : index
    %3 = vector.load %arg2[%c0, %c0_1] : memref<16x128xf32, #tpu.memory_space<vmem>>, vector<16x128xf32>
    %c0_2 = arith.constant 0 : index
    %c0_3 = arith.constant 0 : index
    %4 = vector.load %arg3[%c0_2, %c0_3] : memref<16x128xf32, #tpu.memory_space<vmem>>, vector<16x128xf32>
    %5 = arith.subf %3, %4 : vector<16x128xf32>
    %6 = math.absf %5 : vector<16x128xf32>
    %cst = arith.constant -2.000000e+00 : f32
    %7 = vector.broadcast %cst : f32 to vector<16x128xf32>
    %8 = arith.mulf %7, %6 : vector<16x128xf32>
    %9 = math.exp %8 : vector<16x128xf32>
    %cst_4 = arith.constant 1.000000e+00 : f32
    %10 = vector.broadcast %cst_4 : f32 to vector<16x128xf32>
    %11 = arith.addf %10, %9 : vector<16x128xf32>
    %12 = math.log %11 : vector<16x128xf32>
    %13 = arith.addf %6, %12 : vector<16x128xf32>
    %cst_5 = arith.constant 0.693147182 : f32
    %14 = vector.broadcast %cst_5 : f32 to vector<16x128xf32>
    %15 = arith.subf %13, %14 : vector<16x128xf32>
    %16 = arith.cmpf ogt, %3, %4 : vector<16x128xf32>
    %17 = arith.extui %16 : vector<16x128xi1> to vector<16x128xi32>
    %18 = arith.sitofp %17 : vector<16x128xi32> to vector<16x128xf32>
    %c0_6 = arith.constant 0 : index
    %c0_7 = arith.constant 0 : index
    %c0_8 = arith.constant 0 : index
    %19 = vector.load %arg4[%c0_6, %c0_7, %c0_8] : memref<1x8x128xf32, #tpu.memory_space<vmem>>, vector<1x8x128xf32>
    %20 = arith.mulf %5, %5 : vector<16x128xf32>
    %21 = vector.shape_cast %20 : vector<16x128xf32> to vector<2x8x128xf32>
    %cst_9 = arith.constant dense<0.000000e+00> : vector<8x128xf32>
    %22 = vector.multi_reduction <add>, %21, %cst_9 [0] : vector<2x8x128xf32> to vector<8x128xf32>
    %23 = vector.shape_cast %22 : vector<8x128xf32> to vector<1x8x128xf32>
    %24 = arith.addf %19, %23 : vector<1x8x128xf32>
    %c0_10 = arith.constant 0 : index
    %c0_11 = arith.constant 0 : index
    %c0_12 = arith.constant 0 : index
    %25 = vector.load %arg4[%c0_10, %c0_11, %c0_12] : memref<1x8x128xf32, #tpu.memory_space<vmem>>, vector<1x8x128xf32>
    tpu.vector_store %arg4[%c0_10, %c0_11, %c0_12], %24 {strides = array<i32>} : memref<1x8x128xf32, #tpu.memory_space<vmem>>, vector<1x8x128xf32>,
    %c0_13 = arith.constant 0 : index
    %c0_14 = arith.constant 0 : index
    %c0_15 = arith.constant 0 : index
    %26 = vector.load %arg5[%c0_13, %c0_14, %c0_15] : memref<1x8x128xf32, #tpu.memory_space<vmem>>, vector<1x8x128xf32>
    %27 = arith.mulf %15, %18 : vector<16x128xf32>
    %28 = vector.shape_cast %27 : vector<16x128xf32> to vector<2x8x128xf32>
    %cst_16 = arith.constant dense<0.000000e+00> : vector<8x128xf32>
    %29 = vector.multi_reduction <add>, %28, %cst_16 [0] : vector<2x8x128xf32> to vector<8x128xf32>
    %30 = vector.shape_cast %29 : vector<8x128xf32> to vector<1x8x128xf32>
    %31 = arith.addf %26, %30 : vector<1x8x128xf32>
    %c0_17 = arith.constant 0 : index
    %c0_18 = arith.constant 0 : index
    %c0_19 = arith.constant 0 : index
    %32 = vector.load %arg5[%c0_17, %c0_18, %c0_19] : memref<1x8x128xf32, #tpu.memory_space<vmem>>, vector<1x8x128xf32>
    tpu.vector_store %arg5[%c0_17, %c0_18, %c0_19], %31 {strides = array<i32>} : memref<1x8x128xf32, #tpu.memory_space<vmem>>, vector<1x8x128xf32>,
    %c0_20 = arith.constant 0 : index
    %c0_21 = arith.constant 0 : index
    %c0_22 = arith.constant 0 : index
    %33 = vector.load %arg6[%c0_20, %c0_21, %c0_22] : memref<1x8x128xf32, #tpu.memory_space<vmem>>, vector<1x8x128xf32>
    %34 = vector.shape_cast %18 : vector<16x128xf32> to vector<2x8x128xf32>
    %cst_23 = arith.constant dense<0.000000e+00> : vector<8x128xf32>
    %35 = vector.multi_reduction <add>, %34, %cst_23 [0] : vector<2x8x128xf32> to vector<8x128xf32>
    %36 = vector.shape_cast %35 : vector<8x128xf32> to vector<1x8x128xf32>
    %37 = arith.addf %33, %36 : vector<1x8x128xf32>
    %c0_24 = arith.constant 0 : index
    %c0_25 = arith.constant 0 : index
    %c0_26 = arith.constant 0 : index
    %38 = vector.load %arg6[%c0_24, %c0_25, %c0_26] : memref<1x8x128xf32, #tpu.memory_space<vmem>>, vector<1x8x128xf32>
    tpu.vector_store %arg6[%c0_24, %c0_25, %c0_26], %37 {strides = array<i32>} : memref<1x8x128xf32, #tpu.memory_space<vmem>>, vector<1x8x128xf32>,
    return
  }
  func.func @transform_0(%arg0: i32, %arg1: i32) -> (i32, i32) {
    %c1_i32 = arith.constant 1 : i32
    %0 = arith.muli %arg0, %c1_i32 : i32
    %1 = arith.addi %0, %arg1 : i32
    %c0_i32 = arith.constant 0 : i32
    %c0_i32_0 = arith.constant 0 : i32
    return %1, %c0_i32 : i32, i32
  }
  func.func @transform_1(%arg0: i32, %arg1: i32) -> (i32, i32) {
    %c1_i32 = arith.constant 1 : i32
    %0 = arith.muli %arg0, %c1_i32 : i32
    %1 = arith.addi %0, %arg1 : i32
    %c0_i32 = arith.constant 0 : i32
    %c0_i32_0 = arith.constant 0 : i32
    return %1, %c0_i32 : i32, i32
  }
  func.func @transform_2(%arg0: i32, %arg1: i32) -> (i32, i32, i32) {
    %c0_i32 = arith.constant 0 : i32
    %c0_i32_0 = arith.constant 0 : i32
    %c0_i32_1 = arith.constant 0 : i32
    return %arg0, %c0_i32, %c0_i32_0 : i32, i32, i32
  }
  func.func @transform_3(%arg0: i32, %arg1: i32) -> (i32, i32, i32) {
    %c0_i32 = arith.constant 0 : i32
    %c0_i32_0 = arith.constant 0 : i32
    %c0_i32_1 = arith.constant 0 : i32
    return %arg0, %c0_i32, %c0_i32_0 : i32, i32, i32
  }
  func.func @transform_4(%arg0: i32, %arg1: i32) -> (i32, i32, i32) {
    %c0_i32 = arith.constant 0 : i32
    %c0_i32_0 = arith.constant 0 : i32
    %c0_i32_1 = arith.constant 0 : i32
    return %arg0, %c0_i32, %c0_i32_0 : i32, i32, i32
  }
}

</mosaic_0001>

<bundles_post_ra>
// kernel: tpu_custom_call.1
= control target key start
LH: loop header
LB: loop body
LE: loop exit
PB: predicated region body
PF: predicated region fallthrough
CT: control target
= control target key end

     0   :  { %s1250_s0 = inlined_call_operand.hbm [shape: f32[32,128], index: 0, kind: input, shape index: {}]   ;;  %s1251_s1 = inlined_call_operand.hbm [shape: f32[32,128], index: 1, kind: input, shape index: {}]   ;;  %s1252_s2 = inlined_call_operand.hbm [shape: f32[2,8,128], index: 2, kind: output, shape index: {0}]   ;;  %s1253_s3 = inlined_call_operand.hbm [shape: f32[2,8,128], index: 3, kind: output, shape index: {1}]   ;;  %s1254_s4 = inlined_call_operand.hbm [shape: f32[2,8,128], index: 4, kind: output, shape index: {2}]  }
   0x1   :  { %1259 = sst [smem:[#allocation15_spill]] %s1250_s0 }
   0x2   :  { %10 = vsyncpa [#allocation3], 0 }
   0x3   :  { %12 = vsyncpa [#allocation3 + $0x1], 0 }
   0x4   :  { %13 = vsyncpa [#allocation6], 0 }
   0x5   :  { %15 = vsyncpa [#allocation6 + $0x1], 0 }
   0x6   :  { %16 = vsyncpa [#allocation4], 0 }
   0x7   :  { %18 = vsyncpa [#allocation4 + $0x1], 0 }
   0x8   :  { %19 = vsyncpa [#allocation9], 0 }
   0x9   :  { %21 = vsyncpa [#allocation9 + $0x1], 0  ;;  %s922_s15 = smov 0   ;;  %s924_s16 = smov 0  }
   0xa   :  { %s926_s17 = smov 0   ;;  %s928_s18 = smov 0  }
   0xb   :  { %s930_s19 = smov 0   ;;  %s932_s20 = smov 0  }
   0xc LB: > { %s953_s21 = sadd.s32 4294967295, %s887_s20   ;;  %s1255_s22 = sadd.s32 4294967294, %s887_s20   ;;  %s887_s20 = sphi %s932_s20, %s27_s20   ;;  %s883_s19 = sphi %s930_s19, %s1278_s19   ;;  %s879_s18 = sphi %s928_s18, %s1277_s18   ;;  %s875_s17 = sphi %s926_s17, %s1276_s17   ;;  %s871_s16 = sphi %s924_s16, %s1275_s16   ;;  %s867_s15 = sphi %s922_s15, %s1274_s15  }
   0xd   : > { %s39_s23 = sadd.s32 1, %s883_s19  ;;  %s48_s24 = sadd.s32 1, %s875_s17 }
   0xe   : > { %p41_p0 = scmp.ge.s32.totalorder %s39_s23, 2  ;;  %p55_p1 = scmp.ne.s32.totalorder %s875_s17, %s871_s16 }
   0xf   : > { %p56_p2 = scmp.eq.s32.totalorder %s887_s20, 0  ;;  %p61_p3 = scmp.ne.s32.totalorder %s871_s16, %s867_s15 }
  0x10   : > { %s1280_s23 = smov (%p41_p0, %s39_s23), 0  ;;  %p62_p5 = scmp.eq.s32.totalorder %s953_s21, 0 }
  0x11   : > { %p965_p4 = por %p56_p2, %p55_p1  ;;  %s45_s26 = ssub.s32 %s883_s19, %s1280_s23 }
  0x12   : > { %p113_p6 = scmp.eq.s32.totalorder %s953_s21, 1  ;;  %p46_p7 = scmp.eq.s32.totalorder %s45_s26, 0 }
  0x13   : > { %p973_p8 = por %p62_p5, %p61_p3  ;;  %p119_p10 = scmp.eq.s32.totalorder %s1255_s22, 1 }
  0x14   : > { %p977_p9 = por %p113_p6, %p55_p1  ;;  %p620_p13 = scmp.lt.s32.totalorder %s887_s20, 2 }
  0x15   : > { %s1261_s27 = scalar_select %p973_p8, 1, 0 }
  0x16   : > { %s1262_s28 = scalar_select %p977_p9, 1, 0 }
  0x17   : > { %s984_s29 = scalar_select %p46_p7, %s875_s17, %s48_s24  }
  0x18   : > { %p986_p11 = por %p119_p10, %p61_p3  ;;  %s993_s5 = sand.u32 1, %s875_s17  }
  0x19   : > { %s567_s6 = sshll.u32 %s993_s5, 4  ;;  %s591_s7 = sshll.u32 %s883_s19, 8 }
  0x1a   : > { %s1263_s30 = scalar_select %p986_p11, 1, 0 }
  0x1b   : > { %s1264_s0 = sld [smem:[#allocation15_spill]]  ;;  %s195_s11 = scalar_lea.vmem [#allocation2], %s567_s6 }
  0x1c   : > { %s203_s12 = sshll.u32 %s195_s11, 4  ;;  %p1010_p0 = pnand %p620_p13, %p965_p4  ;;  %s1006_s12 = int_to_ptr.vmem [resolvable:$true] %s203_s12 }
  0x1d   : > { %s192_s14 = scalar_lea.sflag [#allocation3], %s993_s5 }
  0x1e   : > { %p683_p3 = pneg %p1010_p0 }
  0x21   : > { %s1002_s10 = scalar_lea.hbm %s1264_s0, %s591_s7  ;;  %s686_s25 = scalar_lea.hbm %s1264_s0, 512 }
  0x22   : > { %s681_s24 = scalar_lea.hbm %s1002_s10, 256  ;;  %p687_p4 = scmp.lt.u32.totalorder %s1002_s10, %s1264_s0 }
  0x23   : > { %p682_p2 = scmp.ne.s32.totalorder %s1002_s10, %s681_s24  ;;  %p688_p7 = scmp.lt.u32.totalorder %s686_s25, %s681_s24 }
  0x24   : > { %p690_p13 = scmp.lt.u32.totalorder %s681_s24, %s1002_s10 }
  0x25   : > { %p684_p5 = pnand %p683_p3, %p682_p2  ;;  %p689_p10 = por %p688_p7, %p687_p4 }
  0x27   : > { %p685_p6 = pneg %p684_p5  ;;  %p691_p12 = por %p690_p13, %p689_p10 }
  0x29   : > { %p692_p1 = pnand %p691_p12, %p685_p6 }
  0x2b   : > { %695 = shalt.err (!%p692_p1)
}
  0x2c   : > { %s696_s22 = scalar_lea.vmem %s1006_s12, 256  ;;  %s889_s26 = smov [#allocation2]  }
  0x2d   : > { %p697_p2 = scmp.ne.s32.totalorder %s1006_s12, %s696_s22  ;;  %s701_s8 = sshll.u32 %s889_s26, 4  ;;  %s702_s8 = int_to_ptr.vmem [resolvable:$false] %s701_s8 }
  0x2e   : > { %s703_s9 = scalar_lea.vmem %s702_s8, 512  ;;  %p704_p9 = scmp.lt.s32.totalorder %s1006_s12, %s702_s8 }
  0x2f   : > { %p699_p5 = pnand %p697_p2, %p683_p3  ;;  %p705_p4 = scmp.lt.s32.totalorder %s703_s9, %s696_s22 }
  0x31   : > { %p700_p11 = pneg %p699_p5  ;;  %p706_p7 = por %p705_p4, %p704_p9 }
  0x33   : > { %p707_p10 = pnand %p706_p7, %p700_p11 }
  0x35   : > { %710 = shalt.err (!%p707_p10)
}
  0x36   : > { %s1257_s24 = smov 128   ;;  %s891_s25 = smov 8  }
  0x37   : > { %606 = dma.hbm_to_vmem [thread:$0]  (!%p1010_p0), %s1002_s10, 256, %s1006_s12, %s192_s14, %s1257_s24, %s1257_s24, %s891_s25  }
  0x38   : > { %p233_p9 = scmp.lt.s32.totalorder %s887_s20, 3  ;;  %s1052_s26 = scalar_lea.hbm %s1251_s1, %s591_s7 }
  0x39   : > { %p1266_p11 = scmp.ge.s32.totalorder %s887_s20, 1  ;;  %s217_s9 = scalar_lea.vmem [#allocation5], %s567_s6 }
  0x3a   : > { %s225_s0 = sshll.u32 %s217_s9, 4  ;;  %s214_s10 = scalar_lea.sflag [#allocation6], %s993_s5  ;;  %s1062_s0 = int_to_ptr.vmem [resolvable:$true] %s225_s0 }
  0x3b   : > { %p1056_p12 = pnand %p1266_p11, %p233_p9  ;;  %s711_s12 = scalar_lea.hbm %s1052_s26, 256 }
  0x3c   : > { %p712_p1 = scmp.ne.s32.totalorder %s1052_s26, %s711_s12  ;;  %s716_s22 = scalar_lea.hbm %s1251_s1, 512 }
  0x3d   : > { %p717_p2 = scmp.lt.u32.totalorder %s1052_s26, %s1251_s1  ;;  %p718_p5 = scmp.lt.u32.totalorder %s716_s22, %s711_s12 }
  0x3e   : > { %p714_p6 = pnand %p712_p1, %p683_p3  ;;  %p720_p7 = scmp.lt.u32.totalorder %s711_s12, %s1052_s26 }
  0x3f   : > { %p719_p4 = por %p718_p5, %p717_p2 }
  0x40   : > { %p715_p13 = pneg %p714_p6 }
  0x41   : > { %p721_p10 = por %p720_p7, %p719_p4 }
  0x43   : > { %p722_p9 = pnand %p721_p10, %p715_p13 }
  0x45   : > { %725 = shalt.err (!%p722_p9)
}
  0x46   : > { %s726_s6 = scalar_lea.vmem %s1062_s0, 256  ;;  %s892_s9 = smov [#allocation5]  }
  0x47   : > { %p727_p11 = scmp.ne.s32.totalorder %s1062_s0, %s726_s6  ;;  %s731_s7 = sshll.u32 %s892_s9, 4  ;;  %s732_s7 = int_to_ptr.vmem [resolvable:$false] %s731_s7 }
  0x48   : > { %s733_s24 = scalar_lea.vmem %s732_s7, 512  ;;  %p734_p8 = scmp.lt.s32.totalorder %s1062_s0, %s732_s7 }
  0x49   : > { %p729_p1 = pnand %p727_p11, %p683_p3  ;;  %p735_p2 = scmp.lt.s32.totalorder %s733_s24, %s726_s6 }
  0x4b   : > { %p730_p6 = pneg %p729_p1  ;;  %p736_p5 = por %p735_p2, %p734_p8 }
  0x4d   : > { %p737_p4 = pnand %p736_p5, %p730_p6 }
  0x4f   : > { %740 = shalt.err (!%p737_p4)
}
  0x50   : > { %s1268_s12 = smov 128   ;;  %237 = sbr.rel (%p1056_p12) target bundleno = 177 (0xb1), region = 28 }
  0x51   : > { %609 = dma.hbm_to_vmem [thread:$0]  (!%p1010_p0), %s1052_s26, 256, %s1062_s0, %s214_s10, %s1268_s12, %s1268_s12, %s891_s25  }
  0x52   : > { %s1096_s14 = sand.u32 (!%p1056_p12), 1, %s871_s16   ;;  %p1269_p8 = scmp.ne.s32.totalorder (!%p1056_p12), %s1261_s27, 0 }
  0x53   : > { %s574_s22 = sshll.u32 (!%p1056_p12), %s1096_s14, 4  ;;  %s240_s11 = scalar_lea.sflag (!%p1056_p12), [#allocation3], %s1096_s14 }
  0x54   : > { %s243_s13 = scalar_lea.vmem (!%p1056_p12), [#allocation2], %s574_s22 }
  0x57   : > { %850 = dma.done.wait (%p1269_p8), %s240_s11, 256  }
  0x58   : > { %852 = vsyncadd (%p1269_p8), %s240_s11, 4294967040  ;;  %s249_s0 = scalar_lea.sflag [#allocation6], %s1096_s14  ;;  %s252_s5 = scalar_lea.vmem [#allocation5], %s574_s22 }
  0x59   : > { %854 = dma.done.wait (%p1269_p8), %s249_s0, 256  }
  0x5a   : > { %856 = vsyncadd (%p1269_p8), %s249_s0, 4294967040  ;;  %s1110_s25 = sshll.u32 %s1096_s14, 3  ;;  %v303_v0 = vld [vmem:[%s243_s13] sm:$0xff]  ;;  %v304_v1 = vld [vmem:[%s243_s13 + $0x8] sm:$0xff]  ;;  %v893_v7 = vmov 0.0   ;;  %s1123_s27 = sshll.u32 %s879_s18, 7 }
  0x5b   : > { %v305_v2 = vld [vmem:[%s252_s5] sm:$0xff]  ;;  %v306_v3 = vld [vmem:[%s252_s5 + $0x8] sm:$0xff]  ;;  %s277_s26 = scalar_lea.vmem [#allocation7], %s1110_s25  ;;  %s291_s10 = scalar_lea.vmem [#allocation10], %s1110_s25 }
  0x5c   : > { %v1112_v4 = vsub.f32 %v303_v0, %v305_v2  ;;  %vm327_vm0 = vcmp.gt.f32.partialorder %v303_v0, %v305_v2  ;;  %v1114_v5 = vsub.f32 %v304_v1, %v306_v3  ;;  %vm328_vm1 = vcmp.gt.f32.partialorder %v304_v1, %v306_v3  ;;  %s373_s8 = sshll.u32 %s277_s26, 4  ;;  %s1133_s7 = scalar_lea.hbm %s1252_s2, %s1123_s27  ;;  %s1135_s8 = int_to_ptr.vmem [resolvable:$true] %s373_s8 }
  0x5d   : > { %v581_v8 = vsel %vm327_vm0, 1.0, %v893_v7  ;;  %v582_v9 = vsel %vm328_vm1, 1.0, %v893_v7  ;;  %s350_s18 = scalar_lea.sflag [#allocation4], %s1096_s14  ;;  %s741_s24 = scalar_lea.vmem %s1135_s8, 128 }
  0x5e   : > { %v309_v6 = vand.u32 2147483647, %v1112_v4  ;;  %v334_v10 = vmul.f32 %v1112_v4, %v1112_v4  ;;  %v310_v11 = vand.u32 2147483647, %v1114_v5  ;;  %v335_v12 = vmul.f32 %v1114_v5, %v1114_v5  ;;  %p742_p0 = scmp.ne.s32.totalorder %s1135_s8, %s741_s24  ;;  %p1270_p3 = scmp.ne.s32.totalorder %s1262_s28, 0 }
  0x5f   : > { %v346_v13 = vadd.f32 %v582_v9, %v581_v8  ;;  %s894_s12 = smov [#allocation7]  }
  0x60   : > { %v311_v14 = vmul.f32 -2.0, %v309_v6  ;;  %v312_v15 = vmul.f32 -2.0, %v310_v11  ;;  %v336_v16 = vadd.f32 %v335_v12, %v334_v10  ;;  %p743_p12 = pnand %p742_p0, %p1270_p3  ;;  %s745_s22 = sshll.u32 %s894_s12, 4  ;;  %s746_s22 = int_to_ptr.vmem [resolvable:$false] %s745_s22 }
  0x61   : > { %348 = vst [vmem:[%s291_s10] sm:$0xff] %v346_v13  ;;  %s747_s11 = scalar_lea.vmem %s746_s22, 256  ;;  %p748_p7 = scmp.lt.s32.totalorder %s1135_s8, %s746_s22 }
  0x62   : > { %v313_v17 = vmul.f32 1.442695, %v311_v14  ;;  %v315_v18 = vmul.f32 1.442695, %v312_v15  ;;  %338 = vst [vmem:[%s277_s26] sm:$0xff] %v336_v16  ;;  %p744_p13 = pneg %p743_p12  ;;  %p749_p10 = scmp.lt.s32.totalorder %s747_s11, %s741_s24 }
  0x64   : > { %673 = vpow2.f32 %v313_v17  ;;  %p750_p9 = por %p749_p10, %p748_p7 }
  0x65   : > { %675 = vpow2.f32 %v315_v18 }
  0x66   : > { %p751_p11 = pnand %p750_p9, %p744_p13 }
  0x68   : > { %754 = shalt.err (!%p751_p11)
}
  0x69   : > { %s755_s14 = scalar_lea.hbm %s1133_s7, 128  ;;  %s759_s5 = scalar_lea.hbm %s1252_s2, 256 }
  0x6a   : > { %p756_p1 = scmp.ne.s32.totalorder %s1133_s7, %s755_s14  ;;  %p760_p5 = scmp.lt.u32.totalorder %s1133_s7, %s1252_s2 }
  0x6b   : > { %p761_p4 = scmp.lt.u32.totalorder %s759_s5, %s755_s14  ;;  %p763_p0 = scmp.lt.u32.totalorder %s755_s14, %s1133_s7 }
  0x6c   : > { %p757_p6 = pnand %p756_p1, %p1270_p3 }
  0x6d   : > { %p762_p8 = por %p761_p4, %p760_p5 }
  0x6e   : > { %p758_p2 = pneg %p757_p6 }
  0x6f   : > { %p764_p12 = por %p763_p0, %p762_p8 }
  0x71   : > { %p765_p13 = pnand %p764_p12, %p758_p2 }
  0x73   : > { %768 = shalt.err (!%p765_p13)
}
  0x74   : > { %597 = dma.vmem_to_hbm [thread:$0]  (%p1270_p3), %s1135_s8, 128, %s1133_s7, %s350_s18   ;;  %v674_v19 = vpop.eup %673 }
  0x75   : > { %v676_v20 = vpop.eup %675  ;;  %v317_v21 = vadd.f32 1.0, %v674_v19  ;;  %s354_s8 = sand.u32 1, %s953_s21   ;;  %s284_s9 = scalar_lea.vmem [#allocation8], %s1110_s25 }
  0x76   : > { %v318_v22 = vadd.f32 1.0, %v676_v20  ;;  %s386_s7 = sshll.u32 %s284_s9, 4  ;;  %s399_s18 = sshll.u32 %s291_s10, 4  ;;  %s1169_s7 = int_to_ptr.vmem [resolvable:$true] %s386_s7  ;;  %s1171_s18 = int_to_ptr.vmem [resolvable:$true] %s399_s18 }
  0x77   : > { %677 = vlog2.f32 %v317_v21  ;;  %s1167_s22 = scalar_lea.hbm %s1253_s3, %s1123_s27  ;;  %s1177_s21 = scalar_lea.hbm %s1254_s4, %s1123_s27 }
  0x78   : > { %679 = vlog2.f32 %v318_v22  ;;  %s1179_s25 = scalar_lea.sflag [#allocation9], %s354_s8  ;;  %s769_s10 = scalar_lea.vmem %s1169_s7, 128 }
  0x79   : > { %p770_p7 = scmp.ne.s32.totalorder %s1169_s7, %s769_s10  ;;  %s895_s13 = smov [#allocation8]  }
  0x7a   : > { %s773_s0 = sshll.u32 %s895_s13, 4  ;;  %s774_s0 = int_to_ptr.vmem [resolvable:$false] %s773_s0 }
  0x7b   : > { %p771_p10 = pnand %p770_p7, %p1270_p3  ;;  %s775_s5 = scalar_lea.vmem %s774_s0, 256 }
  0x7c   : > { %p776_p11 = scmp.lt.s32.totalorder %s1169_s7, %s774_s0  ;;  %p777_p1 = scmp.lt.s32.totalorder %s775_s5, %s769_s10 }
  0x7d   : > { %p772_p9 = pneg %p771_p10 }
  0x7e   : > { %p778_p6 = por %p777_p1, %p776_p11 }
  0x80   : > { %p779_p2 = pnand %p778_p6, %p772_p9 }
  0x81   : > { %v678_v23 = vpop.eup %677 }
  0x82   : > { %v680_v24 = vpop.eup %679  ;;  %v320_v25 = vmul.f32 0.6931472, %v678_v23 }
  0x83   : > { %v322_v26 = vmul.f32 0.6931472, %v680_v24 }
  0x84   : > { %v323_v27 = vadd.f32 %v320_v25, %v309_v6 }
  0x85   : > { %v324_v28 = vadd.f32 %v322_v26, %v310_v11 }
  0x86   : > { %v579_v29 = vadd.f32 -0.6931472, %v323_v27 }
  0x87   : > { %v580_v30 = vadd.f32 -0.6931472, %v324_v28 }
  0x88   : > { %v340_v31 = vmul.f32 %v581_v8, %v579_v29 }
  0x89   : > { %v341_v32 = vmul.f32 %v582_v9, %v580_v30 }
  0x8b   : > { %v342_v33 = vadd.f32 %v341_v32, %v340_v31 }
  0x8d   : > { %344 = vst [vmem:[%s284_s9] sm:$0xff] %v342_v33 }
  0x8e   : > { %782 = shalt.err (!%p779_p2)
}
  0x8f   : > { %s783_s27 = scalar_lea.hbm %s1167_s22, 128  ;;  %s787_s8 = scalar_lea.hbm %s1253_s3, 256 }
  0x90   : > { %p784_p5 = scmp.ne.s32.totalorder %s1167_s22, %s783_s27  ;;  %p788_p0 = scmp.lt.u32.totalorder %s1167_s22, %s1253_s3 }
  0x91   : > { %p789_p12 = scmp.lt.u32.totalorder %s787_s8, %s783_s27  ;;  %p791_p7 = scmp.lt.u32.totalorder %s783_s27, %s1167_s22 }
  0x92   : > { %p785_p4 = pnand %p784_p5, %p1270_p3 }
  0x93   : > { %p790_p13 = por %p789_p12, %p788_p0 }
  0x94   : > { %p786_p8 = pneg %p785_p4 }
  0x95   : > { %p792_p10 = por %p791_p7, %p790_p13 }
  0x97   : > { %p793_p9 = pnand %p792_p10, %p786_p8 }
  0x99   : > { %796 = shalt.err (!%p793_p9)
}
  0x9a   : > { %598 = dma.vmem_to_hbm [thread:$0]  (%p1270_p3), %s1169_s7, 128, %s1167_s22, %s1179_s25  }
  0x9b   : > { %s797_s12 = scalar_lea.vmem %s1171_s18, 128  ;;  %s896_s11 = smov [#allocation10]  }
  0x9c   : > { %p798_p11 = scmp.ne.s32.totalorder %s1171_s18, %s797_s12  ;;  %s801_s14 = sshll.u32 %s896_s11, 4  ;;  %s802_s14 = int_to_ptr.vmem [resolvable:$false] %s801_s14 }
  0x9d   : > { %s803_s10 = scalar_lea.vmem %s802_s14, 256  ;;  %p804_p2 = scmp.lt.s32.totalorder %s1171_s18, %s802_s14 }
  0x9e   : > { %p799_p1 = pnand %p798_p11, %p1270_p3  ;;  %p805_p5 = scmp.lt.s32.totalorder %s803_s10, %s797_s12 }
  0xa0   : > { %p800_p6 = pneg %p799_p1  ;;  %p806_p4 = por %p805_p5, %p804_p2 }
  0xa2   : > { %p807_p8 = pnand %p806_p4, %p800_p6 }
  0xa4   : > { %810 = shalt.err (!%p807_p8)
}
  0xa5   : > { %s811_s7 = scalar_lea.hbm %s1177_s21, 128  ;;  %s815_s0 = scalar_lea.hbm %s1254_s4, 256 }
  0xa6   : > { %p812_p0 = scmp.ne.s32.totalorder %s1177_s21, %s811_s7  ;;  %p816_p7 = scmp.lt.u32.totalorder %s1177_s21, %s1254_s4 }
  0xa7   : > { %p817_p10 = scmp.lt.u32.totalorder %s815_s0, %s811_s7  ;;  %p819_p11 = scmp.lt.u32.totalorder %s811_s7, %s1177_s21 }
  0xa8   : > { %p813_p12 = pnand %p812_p0, %p1270_p3 }
  0xa9   : > { %p818_p9 = por %p817_p10, %p816_p7 }
  0xaa   : > { %p814_p13 = pneg %p813_p12 }
  0xab   : > { %p820_p1 = por %p819_p11, %p818_p9 }
  0xad   : > { %p821_p6 = pnand %p820_p1, %p814_p13 }
  0xaf   : > { %824 = shalt.err (!%p821_p6)
}
  0xb0   : > { %599 = dma.vmem_to_hbm [thread:$0]  (%p1270_p3), %s1171_s18, 128, %s1177_s21, %s1179_s25  }
  0xb1 PF: > { %s411_s26 = sand.u32 1, %s867_s15   ;;  %p1271_p2 = scmp.ne.s32.totalorder %s1263_s30, 0 }
  0xb2   : > { %p1272_p5 = scmp.ge.s32.totalorder %s887_s20, 2  ;;  %s412_s6 = scalar_lea.sflag [#allocation4], %s411_s26 }
  0xb4   : > { %p611_p4 = pnand %p1272_p5, %p1271_p2 }
  0xb6   : > { %858 = dma.done.wait (!%p611_p4), %s412_s6, 128  }
  0xb7   : > { %860 = vsyncadd (!%p611_p4), %s412_s6, 4294967168  ;;  %s1273_s8 = sadd.s32 4294967294, %s887_s20  }
  0xb8   : > { %s420_s9 = sand.u32 1, %s1273_s8  }
  0xb9   : > { %s421_s24 = scalar_lea.sflag [#allocation9], %s420_s9 }
  0xba   : > { %862 = dma.done.wait (!%p611_p4), %s421_s24, 256  }
  0xbb   : > { %864 = vsyncadd (!%p611_p4), %s421_s24, 4294967040  ;;  %s27_s20 = sadd.s32 1, %s887_s20   ;;  %s1274_s15 = smov %s871_s16 }
  0xbc   : > { %p24_p3 = scmp.ge.s32.totalorder %s27_s20, 4   ;;  %s1275_s16 = smov %s875_s17 }
  0xbd   : > { %s1276_s17 = smov %s984_s29  ;;  %s1277_s18 = smov %s883_s19 }
  0xbe   : > { %s1278_s19 = smov %s1280_s23  ;;  %26 = sbr.rel (!%p24_p3) target bundleno = 12 (0xc), region = 122 }
  0xc5   :  { %435 = vsyncpa [#allocation3], 1 }
  0xc6   :  { %437 = vsyncpa [#allocation3 + $0x1], 1 }
  0xc7   :  { %438 = vsyncpa [#allocation6], 1 }
  0xc8   :  { %440 = vsyncpa [#allocation6 + $0x1], 1 }
  0xc9   :  { %441 = vsyncpa [#allocation4], 1 }
  0xca   :  { %443 = vsyncpa [#allocation4 + $0x1], 1 }
  0xcb   :  { %444 = vsyncpa [#allocation9], 1 }
  0xcc   :  { %446 = vsyncpa [#allocation9 + $0x1], 1 }

</bundles_post_ra>
